<compile_context>
chip_gen: v6e
topology: v6e:2x2x1
jax: 0.10.0
libtpu: 0.0.40
codegen_flags: <defaults>
</compile_context>

<pallas_src>
import numpy as np
import jax
import jax.numpy as jnp
from jax.experimental import pallas as pl
from jax.experimental.pallas import tpu as pltpu

DELTA = 1e-06


def _cdiv(a: int, b: int) -> int:
    return -(-a // b)


def _make_sigmoid_flow_kernel(ndim: int, mollify: float, delta: float):
    """Kernel over one (tr, C) tile; dsp_ref holds 3*ndim lane-dense planes."""
    one_m_mollify = 1.0 - mollify

    def kernel(x_ref, dsp_ref, o_ref):
        x = x_ref[...]                                   # (tr, C)

        # Numerically-stable softmax max over the ndim w-planes.
        w_max = dsp_ref[2 * ndim]
        for k in range(1, ndim):
            w_max = jnp.maximum(w_max, dsp_ref[2 * ndim + k])

        denom = jnp.zeros_like(x)
        acc = jnp.zeros_like(x)
        for k in range(ndim):                            # static unroll
            a_raw = dsp_ref[k]
            b = dsp_ref[ndim + k]
            # Single-path numerically-stable softplus(x) + delta.
            a = (jnp.maximum(a_raw, 0.0)
                 + jnp.log1p(jnp.exp(-jnp.abs(a_raw)))
                 + delta)
            if mollify != 0.0:
                a = a * one_m_mollify + mollify
                b = b * one_m_mollify
            pre_sigm = a * x + b
            sigm = jax.nn.sigmoid(pre_sigm)
            e_w = jnp.exp(dsp_ref[2 * ndim + k] - w_max)
            denom = denom + e_w
            acc = acc + e_w * sigm

        x_pre = acc / denom                              # fused softmax normalization
        x_pre_clipped = x_pre * (1.0 - delta) + delta * 0.5
        # log(t*100) - log(100) == log(t); the two logs fold into one log-ratio.
        o_ref[...] = jnp.log(x_pre_clipped / (1.0 - x_pre_clipped))

    return kernel


def _row_tile_cap() -> int:
    """Bigger row tiles on v7x-class chips; 256 elsewhere."""
    try:
        kind = jax.devices()[0].device_kind.lower()
    except Exception:
        return 256
    return 512 if "v7" in kind else 256


def sigmoid_flow(x, dsparams, num_ds_dim=4, mollify=0.0, delta=DELTA,
                 params_first=None):
    """Pallas wrapper for SigmoidFlow.forward(x, dsparams).

    x:        (B, D) float32.
    dsparams: (3*ndim, B, D)  ["params-first", preferred: no transpose], or
              (B, D, 3*ndim)  [original module layout: pays one extra HBM pass].
    """
    B, D = x.shape
    ndim = num_ds_dim
    K = 3 * ndim
    N = B * D

    if params_first is None:
        if dsparams.shape == (B, D, K):
            params_first = False
        elif dsparams.shape == (K, B, D):
            params_first = True
        else:
            raise ValueError(
                f"dsparams shape {dsparams.shape} matches neither "
                f"(B, D, 3*ndim)={(B, D, K)} nor (3*ndim, B, D)={(K, B, D)}")

    if params_first:
        assert dsparams.shape == (K, B, D)
        dsp2 = dsparams.reshape(K, N)            # contiguous -> free reshape
    else:
        assert dsparams.shape == (B, D, K)
        # NOTE: this transpose is a full extra HBM read+write of the dominant
        # array (~2x end-to-end traffic for this bandwidth-bound op).  Feed
        # dsparams as (3*ndim, B, D) (params_first=True) whenever possible.
        dsp2 = jnp.transpose(dsparams, (2, 0, 1)).reshape(K, N)

    xf = x.reshape(N)

    # ---- lane-dense 2D slab (R, C), C a multiple of 128 -------------------
    if N % 128 == 0:
        Np = N                                   # free reshape, no data copy
    else:
        # Ragged lane count: pad the flat problem to a full (8,128) multiple.
        # This costs one extra pass over the arrays but keeps every vreg and
        # every store lane-dense (zero padding is numerically harmless here).
        Np = 1024 * _cdiv(N, 1024)
        xf = jnp.pad(xf, (0, Np - N))
        dsp2 = jnp.pad(dsp2, ((0, 0), (0, Np - N)))

    C = 512 if Np % 512 == 0 else (256 if Np % 256 == 0 else 128)
    R = Np // C
    x2 = xf.reshape(R, C)
    dsp3 = dsp2.reshape(K, R, C)

    # ---- row tiling --------------------------------------------------------
    tr_cap = _row_tile_cap()
    tr = min(tr_cap, 8 * _cdiv(R, 8))
    grid_rows = _cdiv(R, tr)                     # ragged last block is masked
    # Make sure a 2-TC chip (v7x) has >= 2 blocks to shard across cores.
    if grid_rows == 1 and R >= 16 and R % 16 == 0:
        tr = R // 2
        grid_rows = 2

    kernel = _make_sigmoid_flow_kernel(ndim, float(mollify), float(delta))

    cost = pl.CostEstimate(
        flops=int((11 * ndim + 8) * Np),
        transcendentals=int((4 * ndim + 1) * Np),
        bytes_accessed=int((K + 2) * 4 * Np),
    )

    out = pl.pallas_call(
        kernel,
        out_shape=jax.ShapeDtypeStruct((R, C), x.dtype),
        grid=(grid_rows,),
        in_specs=[
            pl.BlockSpec((tr, C), lambda i: (i, 0)),
            pl.BlockSpec((K, tr, C), lambda i: (0, i, 0)),
        ],
        out_specs=pl.BlockSpec((tr, C), lambda i: (i, 0)),
        compiler_params=pltpu.CompilerParams(
            dimension_semantics=("parallel",),
            vmem_limit_bytes=48 * 1024 * 1024),
        cost_estimate=cost,
    )(x2, dsp3)

    out = out.reshape(-1)[:N].reshape(B, D)
    if D == 1:                                   # PyTorch .squeeze(-1)
        out = out[:, 0]
    return out


def sigmoid_flow_ref(x, dsparams, num_ds_dim=4, mollify=0.0, delta=DELTA):
    """Pure-JAX reference mirroring the PyTorch module (for verification)."""
    ndim = num_ds_dim
    a_ = jax.nn.softplus(dsparams[:, :, 0 * ndim:1 * ndim]) + delta
    b_ = dsparams[:, :, 1 * ndim:2 * ndim]
    w_raw = dsparams[:, :, 2 * ndim:3 * ndim]
    w = jax.nn.softmax(w_raw, axis=2)
    a = a_ * (1 - mollify) + 1.0 * mollify
    b = b_ * (1 - mollify) + 0.0 * mollify
    pre_sigm = a * x[:, :, None] + b
    sigm = jax.nn.sigmoid(pre_sigm)
    x_pre = jnp.sum(w * sigm, axis=2)
    x_pre_clipped = x_pre * (1 - delta) + delta * 0.5
    log_ = lambda t: jnp.log(t * 100.0) - np.float32(np.log(100.0))
    out = log_(x_pre_clipped) - log_(1 - x_pre_clipped)
    if x.shape[-1] == 1:
        out = out[:, 0]
    return out


def _check(key, B, D, num_ds_dim, params_first):
    kx, kp = jax.random.split(key)
    x = jax.random.normal(kx, (B, D), dtype=jnp.float32)
    K = 3 * num_ds_dim
    if params_first:
        # Preferred producer layout: (3*ndim, B, D) -> no transpose anywhere.
        dsp_kbd = jax.random.normal(kp, (K, B, D), dtype=jnp.float32)
        out = sigmoid_flow(x, dsp_kbd, num_ds_dim=num_ds_dim, params_first=True)
        dsparams_bdk = jnp.transpose(dsp_kbd, (1, 2, 0))   # for the reference only
    else:
        # Original module layout: (B, D, 3*ndim).
        dsparams_bdk = jax.random.normal(kp, (B, D, K), dtype=jnp.float32)
        out = sigmoid_flow(x, dsparams_bdk, num_ds_dim=num_ds_dim)
    out = jax.block_until_ready(out)
    ref = jax.block_until_ready(
        sigmoid_flow_ref(x, dsparams_bdk, num_ds_dim=num_ds_dim))
    np.testing.assert_allclose(np.asarray(out), np.asarray(ref),
                               rtol=1e-5, atol=1e-5)


if __name__ == "__main__":
    num_ds_dim = 4            # module default -> num_params = 3 * 4 = 12
    key = jax.random.PRNGKey(0)
    k1, k2, k3, k4 = jax.random.split(key, 4)

    _check(k1, B=2, D=16, num_ds_dim=num_ds_dim, params_first=True)    # tiny, lane-pad path
    _check(k2, B=4, D=1, num_ds_dim=num_ds_dim, params_first=True)     # squeeze(-1) path
    _check(k3, B=5, D=7, num_ds_dim=num_ds_dim, params_first=False)    # (B,D,3*ndim) module layout
    _check(k4, B=16, D=1024, num_ds_dim=num_ds_dim, params_first=True) # lane-dense multi-block grid

    print("KERNEL_OK")
</pallas_src>

<mosaic_0001>
module attributes {stable_mosaic.version = 11 : i64} {
  func.func @kernel(%arg0: i32, %arg1: memref<8x512xf32, #tpu.memory_space<vmem>>, %arg2: memref<12x8x512xf32, #tpu.memory_space<vmem>>, %arg3: memref<8x512xf32, #tpu.memory_space<vmem>>) attributes {dimension_semantics = [#tpu.dimension_semantics<parallel>], iteration_bounds = array<i64: 1>, scalar_prefetch = 0 : i64, scratch_operands = 0 : i64, tpu.core_type = #tpu.core_type<tc>, window_params = [{transform_indices = @transform_0, window_bounds = array<i64: 8, 512>}, {transform_indices = @transform_1, window_bounds = array<i64: 12, 8, 512>}, {transform_indices = @transform_2, window_bounds = array<i64: 8, 512>}]} {
    %c0 = arith.constant 0 : index
    %c0_0 = arith.constant 0 : index
    %0 = vector.load %arg1[%c0, %c0_0] : memref<8x512xf32, #tpu.memory_space<vmem>>, vector<8x512xf32>
    %c8 = arith.constant 8 : index
    %c0_1 = arith.constant 0 : index
    %c0_2 = arith.constant 0 : index
    %1 = vector.load %arg2[%c8, %c0_1, %c0_2] : memref<12x8x512xf32, #tpu.memory_space<vmem>>, vector<1x8x512xf32>
    %2 = vector.shape_cast %1 : vector<1x8x512xf32> to vector<8x512xf32>
    %c9 = arith.constant 9 : index
    %c0_3 = arith.constant 0 : index
    %c0_4 = arith.constant 0 : index
    %3 = vector.load %arg2[%c9, %c0_3, %c0_4] : memref<12x8x512xf32, #tpu.memory_space<vmem>>, vector<1x8x512xf32>
    %4 = vector.shape_cast %3 : vector<1x8x512xf32> to vector<8x512xf32>
    %5 = arith.maximumf %2, %4 : vector<8x512xf32>
    %c10 = arith.constant 10 : index
    %c0_5 = arith.constant 0 : index
    %c0_6 = arith.constant 0 : index
    %6 = vector.load %arg2[%c10, %c0_5, %c0_6] : memref<12x8x512xf32, #tpu.memory_space<vmem>>, vector<1x8x512xf32>
    %7 = vector.shape_cast %6 : vector<1x8x512xf32> to vector<8x512xf32>
    %8 = arith.maximumf %5, %7 : vector<8x512xf32>
    %c11 = arith.constant 11 : index
    %c0_7 = arith.constant 0 : index
    %c0_8 = arith.constant 0 : index
    %9 = vector.load %arg2[%c11, %c0_7, %c0_8] : memref<12x8x512xf32, #tpu.memory_space<vmem>>, vector<1x8x512xf32>
    %10 = vector.shape_cast %9 : vector<1x8x512xf32> to vector<8x512xf32>
    %11 = arith.maximumf %8, %10 : vector<8x512xf32>
    %cst = arith.constant 0.000000e+00 : f32
    %12 = vector.broadcast %cst : f32 to vector<8x512xf32>
    %cst_9 = arith.constant 0.000000e+00 : f32
    %13 = vector.broadcast %cst_9 : f32 to vector<8x512xf32>
    %c0_10 = arith.constant 0 : index
    %c0_11 = arith.constant 0 : index
    %c0_12 = arith.constant 0 : index
    %14 = vector.load %arg2[%c0_10, %c0_11, %c0_12] : memref<12x8x512xf32, #tpu.memory_space<vmem>>, vector<1x8x512xf32>
    %15 = vector.shape_cast %14 : vector<1x8x512xf32> to vector<8x512xf32>
    %c4 = arith.constant 4 : index
    %c0_13 = arith.constant 0 : index
    %c0_14 = arith.constant 0 : index
    %16 = vector.load %arg2[%c4, %c0_13, %c0_14] : memref<12x8x512xf32, #tpu.memory_space<vmem>>, vector<1x8x512xf32>
    %17 = vector.shape_cast %16 : vector<1x8x512xf32> to vector<8x512xf32>
    %cst_15 = arith.constant 0.000000e+00 : f32
    %18 = vector.broadcast %cst_15 : f32 to vector<8x512xf32>
    %19 = arith.maximumf %15, %18 : vector<8x512xf32>
    %20 = math.absf %15 : vector<8x512xf32>
    %cst_16 = arith.constant 0.000000e+00 : f32
    %21 = vector.broadcast %cst_16 : f32 to vector<8x512xf32>
    %22 = arith.subf %21, %20 : vector<8x512xf32>
    %23 = math.exp %22 : vector<8x512xf32>
    %24 = math.log1p %23 : vector<8x512xf32>
    %25 = arith.addf %19, %24 : vector<8x512xf32>
    %cst_17 = arith.constant 9.99999997E-7 : f32
    %26 = vector.broadcast %cst_17 : f32 to vector<8x512xf32>
    %27 = arith.addf %25, %26 : vector<8x512xf32>
    %28 = arith.mulf %27, %0 : vector<8x512xf32>
    %29 = arith.addf %28, %17 : vector<8x512xf32>
    %30 = arith.negf %29 : vector<8x512xf32>
    %31 = math.exp %30 : vector<8x512xf32>
    %cst_18 = arith.constant 1.000000e+00 : f32
    %32 = vector.broadcast %cst_18 : f32 to vector<8x512xf32>
    %33 = arith.addf %32, %31 : vector<8x512xf32>
    %34 = arith.divf %32, %33 : vector<8x512xf32>
    %c8_19 = arith.constant 8 : index
    %c0_20 = arith.constant 0 : index
    %c0_21 = arith.constant 0 : index
    %35 = vector.load %arg2[%c8_19, %c0_20, %c0_21] : memref<12x8x512xf32, #tpu.memory_space<vmem>>, vector<1x8x512xf32>
    %36 = vector.shape_cast %35 : vector<1x8x512xf32> to vector<8x512xf32>
    %37 = arith.subf %36, %11 : vector<8x512xf32>
    %38 = math.exp %37 : vector<8x512xf32>
    %39 = arith.addf %12, %38 : vector<8x512xf32>
    %40 = arith.mulf %38, %34 : vector<8x512xf32>
    %41 = arith.addf %13, %40 : vector<8x512xf32>
    %c1 = arith.constant 1 : index
    %c0_22 = arith.constant 0 : index
    %c0_23 = arith.constant 0 : index
    %42 = vector.load %arg2[%c1, %c0_22, %c0_23] : memref<12x8x512xf32, #tpu.memory_space<vmem>>, vector<1x8x512xf32>
    %43 = vector.shape_cast %42 : vector<1x8x512xf32> to vector<8x512xf32>
    %c5 = arith.constant 5 : index
    %c0_24 = arith.constant 0 : index
    %c0_25 = arith.constant 0 : index
    %44 = vector.load %arg2[%c5, %c0_24, %c0_25] : memref<12x8x512xf32, #tpu.memory_space<vmem>>, vector<1x8x512xf32>
    %45 = vector.shape_cast %44 : vector<1x8x512xf32> to vector<8x512xf32>
    %cst_26 = arith.constant 0.000000e+00 : f32
    %46 = vector.broadcast %cst_26 : f32 to vector<8x512xf32>
    %47 = arith.maximumf %43, %46 : vector<8x512xf32>
    %48 = math.absf %43 : vector<8x512xf32>
    %cst_27 = arith.constant 0.000000e+00 : f32
    %49 = vector.broadcast %cst_27 : f32 to vector<8x512xf32>
    %50 = arith.subf %49, %48 : vector<8x512xf32>
    %51 = math.exp %50 : vector<8x512xf32>
    %52 = math.log1p %51 : vector<8x512xf32>
    %53 = arith.addf %47, %52 : vector<8x512xf32>
    %cst_28 = arith.constant 9.99999997E-7 : f32
    %54 = vector.broadcast %cst_28 : f32 to vector<8x512xf32>
    %55 = arith.addf %53, %54 : vector<8x512xf32>
    %56 = arith.mulf %55, %0 : vector<8x512xf32>
    %57 = arith.addf %56, %45 : vector<8x512xf32>
    %58 = arith.negf %57 : vector<8x512xf32>
    %59 = math.exp %58 : vector<8x512xf32>
    %cst_29 = arith.constant 1.000000e+00 : f32
    %60 = vector.broadcast %cst_29 : f32 to vector<8x512xf32>
    %61 = arith.addf %60, %59 : vector<8x512xf32>
    %62 = arith.divf %60, %61 : vector<8x512xf32>
    %c9_30 = arith.constant 9 : index
    %c0_31 = arith.constant 0 : index
    %c0_32 = arith.constant 0 : index
    %63 = vector.load %arg2[%c9_30, %c0_31, %c0_32] : memref<12x8x512xf32, #tpu.memory_space<vmem>>, vector<1x8x512xf32>
    %64 = vector.shape_cast %63 : vector<1x8x512xf32> to vector<8x512xf32>
    %65 = arith.subf %64, %11 : vector<8x512xf32>
    %66 = math.exp %65 : vector<8x512xf32>
    %67 = arith.addf %39, %66 : vector<8x512xf32>
    %68 = arith.mulf %66, %62 : vector<8x512xf32>
    %69 = arith.addf %41, %68 : vector<8x512xf32>
    %c2 = arith.constant 2 : index
    %c0_33 = arith.constant 0 : index
    %c0_34 = arith.constant 0 : index
    %70 = vector.load %arg2[%c2, %c0_33, %c0_34] : memref<12x8x512xf32, #tpu.memory_space<vmem>>, vector<1x8x512xf32>
    %71 = vector.shape_cast %70 : vector<1x8x512xf32> to vector<8x512xf32>
    %c6 = arith.constant 6 : index
    %c0_35 = arith.constant 0 : index
    %c0_36 = arith.constant 0 : index
    %72 = vector.load %arg2[%c6, %c0_35, %c0_36] : memref<12x8x512xf32, #tpu.memory_space<vmem>>, vector<1x8x512xf32>
    %73 = vector.shape_cast %72 : vector<1x8x512xf32> to vector<8x512xf32>
    %cst_37 = arith.constant 0.000000e+00 : f32
    %74 = vector.broadcast %cst_37 : f32 to vector<8x512xf32>
    %75 = arith.maximumf %71, %74 : vector<8x512xf32>
    %76 = math.absf %71 : vector<8x512xf32>
    %cst_38 = arith.constant 0.000000e+00 : f32
    %77 = vector.broadcast %cst_38 : f32 to vector<8x512xf32>
    %78 = arith.subf %77, %76 : vector<8x512xf32>
    %79 = math.exp %78 : vector<8x512xf32>
    %80 = math.log1p %79 : vector<8x512xf32>
    %81 = arith.addf %75, %80 : vector<8x512xf32>
    %cst_39 = arith.constant 9.99999997E-7 : f32
    %82 = vector.broadcast %cst_39 : f32 to vector<8x512xf32>
    %83 = arith.addf %81, %82 : vector<8x512xf32>
    %84 = arith.mulf %83, %0 : vector<8x512xf32>
    %85 = arith.addf %84, %73 : vector<8x512xf32>
    %86 = arith.negf %85 : vector<8x512xf32>
    %87 = math.exp %86 : vector<8x512xf32>
    %cst_40 = arith.constant 1.000000e+00 : f32
    %88 = vector.broadcast %cst_40 : f32 to vector<8x512xf32>
    %89 = arith.addf %88, %87 : vector<8x512xf32>
    %90 = arith.divf %88, %89 : vector<8x512xf32>
    %c10_41 = arith.constant 10 : index
    %c0_42 = arith.constant 0 : index
    %c0_43 = arith.constant 0 : index
    %91 = vector.load %arg2[%c10_41, %c0_42, %c0_43] : memref<12x8x512xf32, #tpu.memory_space<vmem>>, vector<1x8x512xf32>
    %92 = vector.shape_cast %91 : vector<1x8x512xf32> to vector<8x512xf32>
    %93 = arith.subf %92, %11 : vector<8x512xf32>
    %94 = math.exp %93 : vector<8x512xf32>
    %95 = arith.addf %67, %94 : vector<8x512xf32>
    %96 = arith.mulf %94, %90 : vector<8x512xf32>
    %97 = arith.addf %69, %96 : vector<8x512xf32>
    %c3 = arith.constant 3 : index
    %c0_44 = arith.constant 0 : index
    %c0_45 = arith.constant 0 : index
    %98 = vector.load %arg2[%c3, %c0_44, %c0_45] : memref<12x8x512xf32, #tpu.memory_space<vmem>>, vector<1x8x512xf32>
    %99 = vector.shape_cast %98 : vector<1x8x512xf32> to vector<8x512xf32>
    %c7 = arith.constant 7 : index
    %c0_46 = arith.constant 0 : index
    %c0_47 = arith.constant 0 : index
    %100 = vector.load %arg2[%c7, %c0_46, %c0_47] : memref<12x8x512xf32, #tpu.memory_space<vmem>>, vector<1x8x512xf32>
    %101 = vector.shape_cast %100 : vector<1x8x512xf32> to vector<8x512xf32>
    %cst_48 = arith.constant 0.000000e+00 : f32
    %102 = vector.broadcast %cst_48 : f32 to vector<8x512xf32>
    %103 = arith.maximumf %99, %102 : vector<8x512xf32>
    %104 = math.absf %99 : vector<8x512xf32>
    %cst_49 = arith.constant 0.000000e+00 : f32
    %105 = vector.broadcast %cst_49 : f32 to vector<8x512xf32>
    %106 = arith.subf %105, %104 : vector<8x512xf32>
    %107 = math.exp %106 : vector<8x512xf32>
    %108 = math.log1p %107 : vector<8x512xf32>
    %109 = arith.addf %103, %108 : vector<8x512xf32>
    %cst_50 = arith.constant 9.99999997E-7 : f32
    %110 = vector.broadcast %cst_50 : f32 to vector<8x512xf32>
    %111 = arith.addf %109, %110 : vector<8x512xf32>
    %112 = arith.mulf %111, %0 : vector<8x512xf32>
    %113 = arith.addf %112, %101 : vector<8x512xf32>
    %114 = arith.negf %113 : vector<8x512xf32>
    %115 = math.exp %114 : vector<8x512xf32>
    %cst_51 = arith.constant 1.000000e+00 : f32
    %116 = vector.broadcast %cst_51 : f32 to vector<8x512xf32>
    %117 = arith.addf %116, %115 : vector<8x512xf32>
    %118 = arith.divf %116, %117 : vector<8x512xf32>
    %c11_52 = arith.constant 11 : index
    %c0_53 = arith.constant 0 : index
    %c0_54 = arith.constant 0 : index
    %119 = vector.load %arg2[%c11_52, %c0_53, %c0_54] : memref<12x8x512xf32, #tpu.memory_space<vmem>>, vector<1x8x512xf32>
    %120 = vector.shape_cast %119 : vector<1x8x512xf32> to vector<8x512xf32>
    %121 = arith.subf %120, %11 : vector<8x512xf32>
    %122 = math.exp %121 : vector<8x512xf32>
    %123 = arith.addf %95, %122 : vector<8x512xf32>
    %124 = arith.mulf %122, %118 : vector<8x512xf32>
    %125 = arith.addf %97, %124 : vector<8x512xf32>
    %126 = arith.divf %125, %123 : vector<8x512xf32>
    %cst_55 = arith.constant 0.999998986 : f32
    %127 = vector.broadcast %cst_55 : f32 to vector<8x512xf32>
    %128 = arith.mulf %126, %127 : vector<8x512xf32>
    %cst_56 = arith.constant 5.000000e-07 : f32
    %129 = vector.broadcast %cst_56 : f32 to vector<8x512xf32>
    %130 = arith.addf %128, %129 : vector<8x512xf32>
    %cst_57 = arith.constant 1.000000e+00 : f32
    %131 = vector.broadcast %cst_57 : f32 to vector<8x512xf32>
    %132 = arith.subf %131, %130 : vector<8x512xf32>
    %133 = arith.divf %130, %132 : vector<8x512xf32>
    %134 = math.log %133 : vector<8x512xf32>
    %c0_58 = arith.constant 0 : index
    %c0_59 = arith.constant 0 : index
    %135 = vector.load %arg3[%c0_58, %c0_59] : memref<8x512xf32, #tpu.memory_space<vmem>>, vector<8x512xf32>
    tpu.vector_store %arg3[%c0_58, %c0_59], %134 {strides = array<i32>} : memref<8x512xf32, #tpu.memory_space<vmem>>, vector<8x512xf32>,
    return
  }
  func.func @transform_0(%arg0: i32) -> (i32, i32) {
    %c0_i32 = arith.constant 0 : i32
    %c0_i32_0 = arith.constant 0 : i32
    return %arg0, %c0_i32 : i32, i32
  }
  func.func @transform_1(%arg0: i32) -> (i32, i32, i32) {
    %c0_i32 = arith.constant 0 : i32
    %c0_i32_0 = arith.constant 0 : i32
    %c0_i32_1 = arith.constant 0 : i32
    return %c0_i32, %arg0, %c0_i32_0 : i32, i32, i32
  }
  func.func @transform_2(%arg0: i32) -> (i32, i32) {
    %c0_i32 = arith.constant 0 : i32
    %c0_i32_0 = arith.constant 0 : i32
    return %arg0, %c0_i32 : i32, i32
  }
}

</mosaic_0001>

<bundles_post_ra>
// kernel: tpu_custom_call.1
= control target key start
LH: loop header
LB: loop body
LE: loop exit
PB: predicated region body
PF: predicated region fallthrough
CT: control target
= control target key end

     0   :  { %7 = vsyncpa [#allocation3], 0  ;;  %s1446_s0 = inlined_call_operand.hbm [shape: f32[2,512], index: 0, kind: input, shape index: {}]   ;;  %s1447_s1 = inlined_call_operand.hbm [shape: f32[12,2,512], index: 1, kind: input, shape index: {}]   ;;  %s1448_s2 = inlined_call_operand.hbm [shape: f32[2,512], index: 2, kind: output, shape index: {}]  }
   0x1   :  { %8 = vsyncpa [#allocation6], 0 }
   0x2   :  { %9 = vsyncpa [#allocation4], 0 }
   0x3   :  { %14 = vsyncadd [#allocation3], 384  ;;  %s937_s9 = smov [#allocation2]  }
   0x4   :  { %s15_s10 = sshll.u32 %s937_s9, 4  ;;  %s16_s10 = int_to_ptr.vmem [resolvable:$true] %s15_s10 }
   0x5   :  { %s899_s11 = scalar_lea.vmem %s16_s10, 128  ;;  %s903_s12 = scalar_lea.vmem %s16_s10, 512 }
   0x6   :  { %p900_p0 = scmp.ne.s32.totalorder %s16_s10, %s899_s11  ;;  %p904_p1 = scmp.lt.s32.totalorder %s16_s10, %s16_s10 }
   0x7   :  { %p905_p2 = scmp.lt.s32.totalorder %s903_s12, %s899_s11 }
   0x9   :  { %p906_p3 = por %p905_p2, %p904_p1 }
   0xb   :  { %p907_p4 = pnand %p906_p3, %p900_p0 }
   0xd   :  { %910 = shalt.err (!%p907_p4)
}
   0xe   :  { %s938_s13 = smov 128   ;;  %s939_s14 = smov 8  }
   0xf   :  { %21 = dma.hbm_to_vmem [thread:$0]  %s1446_s0, 128, %s16_s10, [#allocation3], %s938_s13, %s938_s13, %s939_s14  }
  0x10   :  { %26 = vsyncadd [#allocation6], 4608  ;;  %s31_s17 = sld [smem:[#allocation0]]   ;;  %s940_s18 = smov [#allocation5]  }
  0x11   :  { %s39_s19 = sshll.u32 %s940_s18, 4  ;;  %s941_s20 = smov 128   ;;  %s40_s19 = int_to_ptr.vmem [resolvable:$true] %s39_s19 }
  0x12   :  { %46 = sst [smem:[#allocation9]] %s941_s20  ;;  %s942_s21 = smov 512  }
  0x13   :  { %48 = sst [smem:[#allocation9 + $0x1]] %s942_s21  ;;  %s943_s22 = smov 1  }
  0x14   :  { %50 = sst [smem:[#allocation9 + $0x2]] %s943_s22  ;;  %s944_s25 = smov 8  }
  0x15   :  { %52 = sst [smem:[#allocation9 + $0x3]] %s941_s20  ;;  %s945_s26 = smov [#allocation6]  }
  0x16   :  { %s678_s23 = sshll.u32 %s31_s17, 26  ;;  %54 = sst [smem:[#allocation9 + $0x4]] %s941_s20 }
  0x17   :  { %s679_s24 = sadd.s32 134217728, %s678_s23  ;;  %56 = sst [smem:[#allocation9 + $0x5]] %s944_s25 }
  0x18   :  { %s946_s27 = smov 131072  }
  0x19   :  { %58 = dma.general %s1447_s1, 1536, %s40_s19, %s945_s26, %s946_s27, [#allocation9], %s679_s24, 0  }
  0x1a   :  { %931 = dma.done.wait [#allocation3], 512  }
  0x1b   :  { %932 = vsyncadd [#allocation3], 4294966784 }
  0x1c   :  { %933 = dma.done.wait [#allocation6], 6144  }
  0x1d   :  { %934 = vsyncadd [#allocation6], 4294961152  ;;  %v972_v0 = vld [vmem:[#allocation5] sm:$0xff]  ;;  %v974_v1 = vld [vmem:[#allocation5 + $0x8] sm:$0xff] }
  0x1e   :  { %v976_v2 = vld [vmem:[#allocation5 + $0x10] sm:$0xff]  ;;  %v114_v3 = vand.u32 2147483647, %v972_v0  ;;  %v115_v4 = vand.u32 2147483647, %v974_v1  ;;  %v980_v6 = vld [vmem:[#allocation5 + $0x18] sm:$0xff] }
  0x1f   :  { %v116_v7 = vand.u32 2147483647, %v976_v2  ;;  %v117_v9 = vand.u32 2147483647, %v980_v6  ;;  %v984_v12 = vld [vmem:[#allocation5 + $0x20] sm:$0xff]  ;;  %v986_v16 = vld [vmem:[#allocation5 + $0x28] sm:$0xff] }
  0x20   :  { %v118_v5 = vsub.f32 0.0, %v114_v3  ;;  %v119_v8 = vsub.f32 0.0, %v115_v4  ;;  %v244_v17 = vand.u32 2147483647, %v984_v12  ;;  %v989_v18 = vld [vmem:[#allocation5 + $0x100] sm:$0xff]  ;;  %v991_v19 = vld [vmem:[#allocation5 + $0x30] sm:$0xff] }
  0x21   :  { %v120_v11 = vsub.f32 0.0, %v116_v7  ;;  %v121_v14 = vsub.f32 0.0, %v117_v9  ;;  %v993_v20 = vld [vmem:[#allocation5 + $0x120] sm:$0xff]  ;;  %v995_v22 = vld [vmem:[#allocation5 + $0x38] sm:$0xff]  ;;  %v245_v23 = vand.u32 2147483647, %v986_v16 }
  0x22   :  { %v122_v10 = vmul.f32 1.442695, %v118_v5  ;;  %v124_v13 = vmul.f32 1.442695, %v119_v8  ;;  %v248_v24 = vsub.f32 0.0, %v244_v17  ;;  %v998_v25 = vld [vmem:[#allocation5 + $0x108] sm:$0xff]  ;;  %v79_v32 = vmax.f32 %v989_v18, %v993_v20 }
  0x23   :  { %v126_v15 = vmul.f32 1.442695, %v120_v11  ;;  %v128_v21 = vmul.f32 1.442695, %v121_v14  ;;  %v1000_v26 = vld [vmem:[#allocation5 + $0x110] sm:$0xff]  ;;  %v1002_v27 = vld [vmem:[#allocation5 + $0x128] sm:$0xff] }
  0x24   :  { %707 = vpow2.f32 %v122_v10  ;;  %v246_v28 = vand.u32 2147483647, %v991_v19  ;;  %v1005_v29 = vld [vmem:[#allocation5 + $0x118] sm:$0xff]  ;;  %v1007_v30 = vld [vmem:[#allocation5 + $0x130] sm:$0xff]  ;;  %v247_v33 = vand.u32 2147483647, %v995_v22  ;;  %v80_v36 = vmax.f32 %v998_v25, %v1002_v27 }
  0x25   :  { %709 = vpow2.f32 %v124_v13  ;;  %v1009_v31 = vld [vmem:[#allocation5 + $0x138] sm:$0xff]  ;;  %v1014_v34 = vld [vmem:[#allocation5 + $0x140] sm:$0xff]  ;;  %v249_v35 = vsub.f32 0.0, %v245_v23  ;;  %v252_v37 = vmul.f32 1.442695, %v248_v24  ;;  %v81_v38 = vmax.f32 %v1000_v26, %v1007_v30  ;;  %v1022_v40 = vld [vmem:[#allocation5 + $0x148] sm:$0xff] }
  0x26   :  { %711 = vpow2.f32 %v126_v15  ;;  %v82_v39 = vmax.f32 %v1005_v29, %v1009_v31  ;;  %v250_v41 = vsub.f32 0.0, %v246_v28  ;;  %v1024_v42 = vld [vmem:[#allocation5 + $0x150] sm:$0xff]  ;;  %v1026_v43 = vld [vmem:[#allocation5 + $0x158] sm:$0xff]  ;;  %v88_v44 = vmax.f32 %v79_v32, %v1014_v34  ;;  %v1029_v46 = vld [vmem:[#allocation5 + $0x160] sm:$0xff] }
  0x27   :  { %713 = vpow2.f32 %v128_v21  ;;  %v251_v45 = vsub.f32 0.0, %v247_v33  ;;  %v254_v47 = vmul.f32 1.442695, %v249_v35  ;;  %v89_v49 = vmax.f32 %v80_v36, %v1022_v40  ;;  %v1036_v52 = vld [vmem:[#allocation5 + $0x168] sm:$0xff]  ;;  %v1038_v54 = vld [vmem:[#allocation5 + $0x170] sm:$0xff]  ;;  %v1040_v55 = vld [vmem:[#allocation5 + $0x178] sm:$0xff] }
  0x28   :  { %715 = vpow2.f32 %v252_v37  ;;  %v90_v50 = vmax.f32 %v81_v38, %v1024_v42  ;;  %v91_v51 = vmax.f32 %v82_v39, %v1026_v43  ;;  %v256_v53 = vmul.f32 1.442695, %v250_v41  ;;  %v1045_v58 = vld [vmem:[#allocation5 + $0x40] sm:$0xff]  ;;  %v1050_v61 = vld [vmem:[#allocation5 + $0x48] sm:$0xff]  ;;  %v1068_v10 = vld [vmem:[#allocation5 + $0x50] sm:$0xff] }
  0x29   :  { %v1043_v56 = vmax.f32 %v88_v44, %v1029_v46  ;;  %v258_v57 = vmul.f32 1.442695, %v251_v45  ;;  %717 = vpow2.f32 %v254_v47  ;;  %v1053_v62 = vmax.f32 %v89_v49, %v1036_v52 }
  0x2a   :  { %v1058_v3 = vmax.f32 %v90_v50, %v1038_v54  ;;  %v1061_v4 = vmax.f32 %v91_v51, %v1040_v55  ;;  %719 = vpow2.f32 %v256_v53  ;;  %v374_v5 = vand.u32 2147483647, %v1045_v58 }
  0x2b   :  { %v206_v8 = vsub.f32 %v989_v18, %v1043_v56  ;;  %721 = vpow2.f32 %v258_v57  ;;  %v375_v9 = vand.u32 2147483647, %v1050_v61  ;;  %v207_v14 = vsub.f32 %v998_v25, %v1053_v62  ;;  %v1079_v18 = vld [vmem:[#allocation5 + $0x58] sm:$0xff] }
  0x2c   :  { %v208_v15 = vsub.f32 %v1000_v26, %v1058_v3  ;;  %v209_v17 = vsub.f32 %v1005_v29, %v1061_v4  ;;  %v378_v21 = vsub.f32 0.0, %v374_v5  ;;  %v376_v24 = vand.u32 2147483647, %v1068_v10 }
  0x2d   :  { %v210_v23 = vmul.f32 1.442695, %v206_v8  ;;  %v379_v28 = vsub.f32 0.0, %v375_v9  ;;  %v110_v32 = vmax.f32 %v972_v0, 0.0  ;;  %v111_v25 = vmax.f32 %v974_v1, 0.0 }
  0x2e   :  { %v212_v35 = vmul.f32 1.442695, %v207_v14  ;;  %v377_v26 = vand.u32 2147483647, %v1079_v18  ;;  %v112_v29 = vmax.f32 %v976_v2, 0.0  ;;  %v113_v37 = vmax.f32 %v980_v6, 0.0 }
  0x2f   :  { %v214_v38 = vmul.f32 1.442695, %v208_v15  ;;  %v382_v39 = vmul.f32 1.442695, %v378_v21  ;;  %v216_v41 = vmul.f32 1.442695, %v209_v17  ;;  %v336_v50 = vsub.f32 %v993_v20, %v1043_v56 }
  0x30   :  { %v380_v44 = vsub.f32 0.0, %v376_v24  ;;  %v384_v45 = vmul.f32 1.442695, %v379_v28  ;;  %v337_v8 = vsub.f32 %v1002_v27, %v1053_v62 }
  0x31   :  { %v1031_v48 = vpop.eup %707 }
  0x32   :  { %v1047_v59 = vpop.eup %709  ;;  %v130_v60 = vadd.f32 1.0, %v1031_v48  ;;  %v133_v47 = vmul.f32 -0.5, %v1031_v48  ;;  %v386_v14 = vmul.f32 1.442695, %v380_v44  ;;  %v136_v24 = vand.u32 2147483647, %v1031_v48 }
  0x33   :  { %v1055_v63 = vpop.eup %711  ;;  %v139_v7 = vadd.f32 1.0, %v1047_v59  ;;  %v142_v20 = vmul.f32 -0.5, %v1047_v59 }
  0x34   :  { %723 = vlog2.f32 %v130_v60  ;;  %v1070_v11 = vpop.eup %713  ;;  %v148_v13 = vadd.f32 1.0, %v1055_v63  ;;  %v381_v60 = vsub.f32 0.0, %v377_v26  ;;  %v134_v17 = vadd.f32 1.0, %v133_v47 }
  0x35   :  { %725 = vlog2.f32 %v139_v7  ;;  %v157_v33 = vadd.f32 1.0, %v1070_v11  ;;  %v1086_v36 = vpop.eup %715  ;;  %v151_v28 = vmul.f32 -0.5, %v1055_v63  ;;  %v342_v26 = vmul.f32 1.442695, %v337_v8 }
  0x36   :  { %727 = vlog2.f32 %v148_v13  ;;  %v1094_v51 = vpop.eup %717  ;;  %v260_v57 = vadd.f32 1.0, %v1086_v36  ;;  %v338_v13 = vsub.f32 %v1007_v30, %v1058_v3  ;;  %v135_v47 = vmul.f32 %v1031_v48, %v134_v17 }
  0x37   :  { %729 = vpow2.f32 %v210_v23  ;;  %v1102_v9 = vpop.eup %719  ;;  %v269_v21 = vadd.f32 1.0, %v1094_v51  ;;  %v339_v23 = vsub.f32 %v1009_v31, %v1061_v4  ;;  %v160_v7 = vmul.f32 -0.5, %v1070_v11 }
  0x38   :  { %731 = vlog2.f32 %v157_v33  ;;  %v1107_v15 = vpop.eup %721  ;;  %v388_v33 = vmul.f32 1.442695, %v381_v60  ;;  %v278_v30 = vadd.f32 1.0, %v1102_v9  ;;  %vm1119_vm0 = vcmp.lt.f32.partialorder %v136_v24, 0.0004427343 }
  0x39   :  { %733 = vpow2.f32 %v212_v35  ;;  %v340_v35 = vmul.f32 1.442695, %v336_v50  ;;  %v287_v44 = vadd.f32 1.0, %v1107_v15  ;;  %v154_v8 = vand.u32 2147483647, %v1055_v63 }
  0x3a   :  { %735 = vpow2.f32 %v382_v39  ;;  %v143_v39 = vadd.f32 1.0, %v142_v20  ;;  %v344_v20 = vmul.f32 1.442695, %v338_v13  ;;  %v163_v13 = vand.u32 2147483647, %v1070_v11 }
  0x3b   :  { %737 = vpow2.f32 %v384_v45  ;;  %vm1144_vm2 = vcmp.lt.f32.partialorder %v154_v8, 0.0004427343 }
  0x3c   :  { %739 = vpow2.f32 %v214_v38  ;;  %v145_v38 = vand.u32 2147483647, %v1047_v59  ;;  %v144_v17 = vmul.f32 %v1047_v59, %v143_v39  ;;  %v263_v59 = vmul.f32 -0.5, %v1086_v36 }
  0x3d   :  { %741 = vlog2.f32 %v260_v57  ;;  %v266_v39 = vand.u32 2147483647, %v1086_v36  ;;  %vm1160_vm3 = vcmp.lt.f32.partialorder %v163_v13, 0.0004427343 }
  0x3e   :  { %743 = vpow2.f32 %v216_v41  ;;  %v152_v41 = vadd.f32 1.0, %v151_v28  ;;  %vm1134_vm1 = vcmp.lt.f32.partialorder %v145_v38, 0.0004427343  ;;  %v272_v38 = vmul.f32 -0.5, %v1094_v51 }
  0x3f   :  { %745 = vpow2.f32 %v386_v14  ;;  %v1126_v14 = vmul.f32 1.442695, %v339_v23  ;;  %vm1169_vm4 = vcmp.lt.f32.partialorder %v266_v39, 0.0004427343  ;;  %v290_v28 = vmul.f32 -0.5, %v1107_v15  ;;  %v1184_v39 = vld [vmem:[#allocation2] sm:$0xff] }
  0x40   :  { %747 = vlog2.f32 %v269_v21 }
  0x41   :  { %v724_v27 = vpop.eup %723  ;;  %749 = vpow2.f32 %v388_v33  ;;  %v161_v33 = vadd.f32 1.0, %v160_v7  ;;  %v281_v7 = vmul.f32 -0.5, %v1102_v9  ;;  %v291_v2 = vadd.f32 1.0, %v290_v28 }
  0x42   :  { %v726_v45 = vpop.eup %725  ;;  %v132_v31 = vmul.f32 0.6931472, %v724_v27  ;;  %751 = vlog2.f32 %v278_v30 }
  0x43   :  { %v728_v60 = vpop.eup %727  ;;  %v141_v48 = vmul.f32 0.6931472, %v726_v45  ;;  %753 = vlog2.f32 %v287_v44  ;;  %v153_v45 = vmul.f32 %v1055_v63, %v152_v41  ;;  %v162_v21 = vmul.f32 %v1070_v11, %v161_v33 }
  0x44   :  { %v1130_v27 = vpop.eup %729  ;;  %v138_v24 = vsel %vm1119_vm0, %v135_v47, %v132_v31  ;;  %v150_v30 = vmul.f32 0.6931472, %v728_v60  ;;  %755 = vpow2.f32 %v340_v35  ;;  %v282_v57 = vadd.f32 1.0, %v281_v7  ;;  %v1200_v7 = vld [vmem:[#allocation2 + $0x8] sm:$0xff] }
  0x45   :  { %1458 = vst [vmem:[#allocation13_spill] sm:$0xff] %v1130_v27  ;;  %v732_v23 = vpop.eup %731  ;;  %v147_v63 = vsel %vm1134_vm1, %v144_v17, %v141_v48  ;;  %v166_v47 = vadd.f32 %v138_v24, %v110_v32  ;;  %757 = vpow2.f32 %v342_v26  ;;  %v264_v32 = vadd.f32 1.0, %v263_v59 }
  0x46   :  { %v1142_v44 = vpop.eup %733  ;;  %v159_v8 = vmul.f32 0.6931472, %v732_v23  ;;  %v156_v0 = vsel %vm1144_vm2, %v153_v45, %v150_v30  ;;  %v275_v48 = vand.u32 2147483647, %v1094_v51  ;;  %v167_v11 = vadd.f32 %v147_v63, %v111_v25 }
  0x47   :  { %1461 = vst [vmem:[#allocation14_spill] sm:$0xff] %v1142_v44  ;;  %v1150_v31 = vpop.eup %735  ;;  %v273_v24 = vadd.f32 1.0, %v272_v38  ;;  %v170_v23 = vadd.f32 1e-06, %v166_v47  ;;  %v284_v30 = vand.u32 2147483647, %v1102_v9  ;;  %759 = vpow2.f32 %v344_v20 }
  0x48   :  { %v1157_v60 = vpop.eup %737  ;;  %v390_v33 = vadd.f32 1.0, %v1150_v31  ;;  %v165_v1 = vsel %vm1160_vm3, %v162_v21, %v159_v8  ;;  %v168_v25 = vadd.f32 %v156_v0, %v112_v29  ;;  %v293_v38 = vand.u32 2147483647, %v1107_v15  ;;  %v1202_v8 = vld [vmem:[#allocation2 + $0x10] sm:$0xff]  ;;  %v106_v0 = vld [vmem:[#allocation5 + $0x80] sm:$0xff]  ;;  %v1240_v44 = vld [vmem:[#allocation2 + $0x18] sm:$0xff] }
  0x49   :  { %v1165_v50 = vpop.eup %739  ;;  %v399_v45 = vadd.f32 1.0, %v1157_v60  ;;  %v265_v41 = vmul.f32 %v1086_v36, %v264_v32  ;;  %vm1192_vm5 = vcmp.lt.f32.partialorder %v275_v48, 0.0004427343  ;;  %v393_v5 = vmul.f32 -0.5, %v1150_v31 }
  0x4a   :  { %1466 = vst [vmem:[#allocation15_spill] sm:$0xff] %v1165_v50  ;;  %v742_v17 = vpop.eup %741  ;;  %v171_v35 = vadd.f32 1e-06, %v167_v11  ;;  %v274_v21 = vmul.f32 %v1094_v51, %v273_v24  ;;  %761 = vlog2.f32 %v390_v33  ;;  %v169_v36 = vadd.f32 %v165_v1, %v113_v37  ;;  %v1222_v1 = vld [vmem:[#allocation5 + $0x68] sm:$0xff] }
  0x4b   :  { %v1178_v13 = vpop.eup %743  ;;  %v262_v47 = vmul.f32 0.6931472, %v742_v17  ;;  %v174_v32 = vmul.f32 %v170_v23, %v1184_v39  ;;  %763 = vlog2.f32 %v399_v45  ;;  %v172_v11 = vadd.f32 1e-06, %v168_v25  ;;  %v1220_v45 = vld [vmem:[#allocation5 + $0x60] sm:$0xff] }
  0x4c   :  { %1469 = vst [vmem:[#allocation16_spill] sm:$0xff] %v1178_v13  ;;  %v1182_v59 = vpop.eup %745  ;;  %v283_v51 = vmul.f32 %v1102_v9, %v282_v57  ;;  %vm1209_vm6 = vcmp.lt.f32.partialorder %v284_v30, 0.0004427343  ;;  %vm1213_vm7 = vcmp.lt.f32.partialorder %v293_v38, 0.0004427343  ;;  %v394_v33 = vadd.f32 1.0, %v393_v5 }
  0x4d   :  { %v748_v63 = vpop.eup %747  ;;  %v408_v48 = vadd.f32 1.0, %v1182_v59  ;;  %v268_v6 = vsel %vm1169_vm4, %v265_v41, %v262_v47  ;;  %v175_v9 = vmul.f32 %v171_v35, %v1200_v7  ;;  %v292_v25 = vmul.f32 %v1107_v15, %v291_v2  ;;  %v1227_v38 = vld [vmem:[#allocation5 + $0x70] sm:$0xff]  ;;  %v107_v41 = vld [vmem:[#allocation5 + $0x88] sm:$0xff]  ;;  %v1231_v47 = vld [vmem:[#allocation5 + $0x78] sm:$0xff] }
  0x4e   :  { %v1197_v53 = vpop.eup %749  ;;  %v271_v37 = vmul.f32 0.6931472, %v748_v63  ;;  %v396_v57 = vand.u32 2147483647, %v1150_v31  ;;  %v173_v26 = vadd.f32 1e-06, %v169_v36  ;;  %v178_v5 = vadd.f32 %v174_v32, %v106_v0 }
  0x4f   :  { %v752_v29 = vpop.eup %751  ;;  %v417_v23 = vadd.f32 1.0, %v1197_v53  ;;  %765 = vlog2.f32 %v408_v48  ;;  %v176_v35 = vmul.f32 %v172_v11, %v1202_v8  ;;  %v504_v2 = vand.u32 2147483647, %v1220_v45 }
  0x50   :  { %v754_v17 = vpop.eup %753  ;;  %v280_v30 = vmul.f32 0.6931472, %v752_v29  ;;  %v1478_v29 = vmax.f32 %v984_v12, 0.0  ;;  %v505_v50 = vand.u32 2147483647, %v1222_v1  ;;  %v277_v0 = vsel %vm1192_vm5, %v274_v21, %v271_v37 }
  0x51   :  { %v1229_v49 = vpop.eup %755  ;;  %v289_v63 = vmul.f32 0.6931472, %v754_v17  ;;  %v1245_v36 = vmul.f32 %v1150_v31, %v394_v33  ;;  %767 = vlog2.f32 %v417_v23  ;;  %v506_v32 = vand.u32 2147483647, %v1227_v38 }
  0x52   :  { %1476 = vst [vmem:[#allocation17_spill] sm:$0xff] %v1229_v49  ;;  %v1233_v13 = vpop.eup %757  ;;  %v296_v15 = vadd.f32 %v268_v6, %v1478_v29  ;;  %v179_v48 = vadd.f32 %v175_v9, %v107_v41  ;;  %v286_v12 = vsel %vm1209_vm6, %v283_v51, %v280_v30  ;;  %v507_v17 = vand.u32 2147483647, %v1231_v47  ;;  %v108_v6 = vld [vmem:[#allocation5 + $0x90] sm:$0xff]  ;;  %v109_v41 = vld [vmem:[#allocation5 + $0x98] sm:$0xff] }
  0x53   :  { %1477 = vst [vmem:[#allocation18_spill] sm:$0xff] %v1233_v13  ;;  %v508_v11 = vsub.f32 0.0, %v504_v2  ;;  %v295_v29 = vsel %vm1213_vm7, %v292_v25, %v289_v63  ;;  %vm1253_vm8 = vcmp.lt.f32.partialorder %v396_v57, 0.0004427343  ;;  %v402_v31 = vmul.f32 -0.5, %v1157_v60 }
  0x54   :  { %v509_v21 = vsub.f32 0.0, %v505_v50  ;;  %v510_v37 = vsub.f32 0.0, %v506_v32  ;;  %v1258_v33 = vpop.eup %759  ;;  %v177_v24 = vmul.f32 %v173_v26, %v1240_v44  ;;  %v1482_v51 = vmax.f32 %v986_v16, 0.0 }
  0x55   :  { %1481 = vst [vmem:[#allocation19_spill] sm:$0xff] %v1258_v33  ;;  %v300_v9 = vadd.f32 1e-06, %v296_v15  ;;  %v512_v30 = vmul.f32 1.442695, %v508_v11  ;;  %v1483_v25 = vmax.f32 %v991_v19, 0.0  ;;  %v180_v13 = vadd.f32 %v176_v35, %v108_v6 }
  0x56   :  { %v297_v23 = vadd.f32 %v277_v0, %v1482_v51  ;;  %v680_v28 = vmul.f32 -1.442695, %v178_v5  ;;  %v511_v63 = vsub.f32 0.0, %v507_v17  ;;  %v514_v2 = vmul.f32 1.442695, %v509_v21  ;;  %v236_v17 = vld [vmem:[#allocation5 + $0xa0] sm:$0xff] }
  0x57   :  { %v298_v57 = vadd.f32 %v286_v12, %v1483_v25  ;;  %v1484_v50 = vmax.f32 %v995_v22, 0.0  ;;  %769 = vpow2.f32 %v512_v30  ;;  %v516_v33 = vmul.f32 1.442695, %v510_v37  ;;  %v762_v49 = vpop.eup %761  ;;  %v237_v30 = vld [vmem:[#allocation5 + $0xa8] sm:$0xff]  ;;  %v238_v25 = vld [vmem:[#allocation5 + $0xb0] sm:$0xff] }
  0x58   :  { %v681_v26 = vmul.f32 -1.442695, %v179_v48  ;;  %v403_v27 = vadd.f32 1.0, %v402_v31  ;;  %v411_v16 = vmul.f32 -0.5, %v1182_v59  ;;  %771 = vpow2.f32 %v514_v2  ;;  %v764_v15 = vpop.eup %763 }
  0x59   :  { %v299_v32 = vadd.f32 %v295_v29, %v1484_v50  ;;  %v181_v0 = vadd.f32 %v177_v24, %v109_v41  ;;  %v301_v5 = vadd.f32 1e-06, %v297_v23  ;;  %v304_v19 = vmul.f32 %v300_v9, %v1184_v39  ;;  %v239_v50 = vld [vmem:[#allocation5 + $0xb8] sm:$0xff] }
  0x5a   :  { %v405_v12 = vand.u32 2147483647, %v1157_v60  ;;  %v302_v35 = vadd.f32 1e-06, %v298_v57  ;;  %v420_v22 = vmul.f32 -0.5, %v1197_v53  ;;  %773 = vpow2.f32 %v516_v33 }
  0x5b   :  { %v518_v11 = vmul.f32 1.442695, %v511_v63  ;;  %775 = vpow2.f32 %v680_v28  ;;  %v682_v6 = vmul.f32 -1.442695, %v180_v13  ;;  %v303_v48 = vadd.f32 1e-06, %v299_v32 }
  0x5c   :  { %v392_v29 = vmul.f32 0.6931472, %v762_v49  ;;  %777 = vpow2.f32 %v681_v26  ;;  %v401_v31 = vmul.f32 0.6931472, %v764_v15  ;;  %v404_v21 = vmul.f32 %v1157_v60, %v403_v27  ;;  %v766_v24 = vpop.eup %765 }
  0x5d   :  { %v412_v37 = vadd.f32 1.0, %v411_v16  ;;  %v305_v51 = vmul.f32 %v301_v5, %v1200_v7  ;;  %v308_v23 = vadd.f32 %v304_v19, %v236_v17  ;;  %vm1273_vm9 = vcmp.lt.f32.partialorder %v405_v12, 0.0004427343 }
  0x5e   :  { %v414_v33 = vand.u32 2147483647, %v1182_v59  ;;  %v306_v13 = vmul.f32 %v302_v35, %v1202_v8  ;;  %v421_v41 = vadd.f32 1.0, %v420_v22  ;;  %v1487_v49 = vsub.f32 %v1014_v34, %v1043_v56  ;;  %v768_v27 = vpop.eup %767 }
  0x5f   :  { %779 = vpow2.f32 %v518_v11  ;;  %v683_v60 = vmul.f32 -1.442695, %v181_v0  ;;  %v307_v57 = vmul.f32 %v303_v48, %v1240_v44  ;;  %v398_v63 = vsel %vm1253_vm8, %v1245_v36, %v392_v29 }
  0x60   :  { %v470_v28 = vmul.f32 1.442695, %v1487_v49  ;;  %v423_v2 = vand.u32 2147483647, %v1197_v53  ;;  %781 = vpow2.f32 %v682_v6  ;;  %v407_v32 = vsel %vm1273_vm9, %v404_v21, %v401_v31 }
  0x61   :  { %v410_v26 = vmul.f32 0.6931472, %v766_v24  ;;  %v413_v34 = vmul.f32 %v1182_v59, %v412_v37  ;;  %v309_v16 = vadd.f32 %v305_v51, %v237_v30  ;;  %v684_v15 = vmul.f32 -1.442695, %v308_v23 }
  0x62   :  { %783 = vpow2.f32 %v1126_v14  ;;  %vm1291_vm10 = vcmp.lt.f32.partialorder %v414_v33, 0.0004427343  ;;  %v310_v20 = vadd.f32 %v306_v13, %v238_v25  ;;  %v419_v36 = vmul.f32 0.6931472, %v768_v27 }
  0x63   :  { %v422_v5 = vmul.f32 %v1197_v53, %v421_v41  ;;  %v1490_v19 = vmax.f32 %v1045_v58, 0.0  ;;  %v311_v17 = vadd.f32 %v307_v57, %v239_v50  ;;  %vm1298_vm11 = vcmp.lt.f32.partialorder %v423_v2, 0.0004427343  ;;  %v367_v2 = vld [vmem:[#allocation5 + $0xc8] sm:$0xff] }
  0x64   :  { %v1493_v59 = vmax.f32 %v1050_v61, 0.0  ;;  %785 = vpow2.f32 %v470_v28  ;;  %v1304_v14 = vpop.eup %769  ;;  %v373_v11 = vmax.f32 %v1079_v18, 0.0  ;;  %v416_v53 = vsel %vm1291_vm10, %v413_v34, %v410_v26 }
  0x65   :  { %v426_v12 = vadd.f32 %v398_v63, %v1490_v19  ;;  %787 = vpow2.f32 %v683_v60  ;;  %v1309_v6 = vpop.eup %771  ;;  %v685_v58 = vmul.f32 -1.442695, %v309_v16  ;;  %v467_v48 = vsub.f32 %v1022_v40, %v1053_v62  ;;  %v366_v60 = vld [vmem:[#allocation5 + $0xc0] sm:$0xff] }
  0x66   :  { %v427_v22 = vadd.f32 %v407_v32, %v1493_v59  ;;  %789 = vpow2.f32 %v684_v15  ;;  %v520_v29 = vadd.f32 1.0, %v1304_v14  ;;  %v686_v61 = vmul.f32 -1.442695, %v310_v20  ;;  %v368_v59 = vld [vmem:[#allocation5 + $0xd0] sm:$0xff] }
  0x67   :  { %v425_v31 = vsel %vm1298_vm11, %v422_v5, %v419_v36  ;;  %v430_v21 = vadd.f32 1e-06, %v426_v12  ;;  %v529_v37 = vadd.f32 1.0, %v1309_v6  ;;  %v1317_v18 = vpop.eup %773  ;;  %v687_v24 = vmul.f32 -1.442695, %v311_v17 }
  0x68   :  { %v1494_v51 = vmax.f32 %v1068_v10, 0.0  ;;  %v431_v9 = vadd.f32 1e-06, %v427_v22  ;;  %791 = vlog2.f32 %v520_v29  ;;  %v776_v33 = vpop.eup %775  ;;  %v429_v30 = vadd.f32 %v425_v31, %v373_v11  ;;  %v369_v31 = vld [vmem:[#allocation5 + $0xd8] sm:$0xff] }
  0x69   :  { %793 = vlog2.f32 %v529_v37  ;;  %v778_v40 = vpop.eup %777  ;;  %v468_v13 = vsub.f32 %v1024_v42, %v1058_v3  ;;  %v472_v41 = vmul.f32 1.442695, %v467_v48  ;;  %v434_v49 = vmul.f32 %v430_v21, %v1184_v39 }
  0x6a   :  { %v428_v23 = vadd.f32 %v416_v53, %v1494_v51  ;;  %795 = vpow2.f32 %v685_v58  ;;  %v469_v28 = vsub.f32 %v1026_v43, %v1061_v4  ;;  %v538_v10 = vadd.f32 1.0, %v1317_v18 }
  0x6b   :  { %797 = vpow2.f32 %v686_v61  ;;  %v435_v57 = vmul.f32 %v431_v9, %v1200_v7  ;;  %v523_v63 = vmul.f32 -0.5, %v1304_v14  ;;  %v532_v42 = vmul.f32 -0.5, %v1309_v6 }
  0x6c   :  { %v1327_v27 = vpop.eup %779  ;;  %799 = vpow2.f32 %v687_v24  ;;  %v432_v25 = vadd.f32 1e-06, %v428_v23  ;;  %v194_v26 = vadd.f32 1.0, %v776_v33  ;;  %v433_v43 = vadd.f32 1e-06, %v429_v30 }
  0x6d   :  { %801 = vlog2.f32 %v538_v10  ;;  %v547_v50 = vadd.f32 1.0, %v1327_v27  ;;  %v782_v32 = vpop.eup %781  ;;  %v474_v34 = vmul.f32 1.442695, %v468_v13  ;;  %v438_v15 = vadd.f32 %v434_v49, %v366_v60 }
  0x6e   :  { %803 = vpow2.f32 %v472_v41  ;;  %v1335_v0 = vmul.f32 1.442695, %v469_v28  ;;  %v500_v20 = vmax.f32 %v1220_v45, 0.0  ;;  %v195_v36 = vadd.f32 1.0, %v778_v40 }
  0x6f   :  { %v1333_v16 = vpop.eup %783  ;;  %805 = vlog2.f32 %v547_v50  ;;  %v436_v5 = vmul.f32 %v432_v25, %v1202_v8  ;;  %v439_v19 = vadd.f32 %v435_v57, %v367_v2  ;;  %v524_v12 = vadd.f32 1.0, %v523_v63 }
  0x70   :  { %v196_v35 = vadd.f32 1.0, %v782_v32  ;;  %v526_v22 = vand.u32 2147483647, %v1304_v14  ;;  %v533_v11 = vadd.f32 1.0, %v532_v42  ;;  %v541_v53 = vmul.f32 -0.5, %v1317_v18 }
  0x71   :  { %v1339_v17 = vpop.eup %785  ;;  %807 = vrcp.f32 %v194_v26  ;;  %v437_v45 = vmul.f32 %v433_v43, %v1240_v44  ;;  %v501_v48 = vmax.f32 %v1222_v1, 0.0  ;;  %v535_v29 = vand.u32 2147483647, %v1309_v6 }
  0x72   :  { %v1343_v58 = vpop.eup %787  ;;  %v688_v21 = vmul.f32 -1.442695, %v438_v15  ;;  %809 = vpow2.f32 %v474_v34  ;;  %v502_v37 = vmax.f32 %v1227_v38, 0.0  ;;  %v550_v24 = vmul.f32 -0.5, %v1327_v27 }
  0x73   :  { %v790_v61 = vpop.eup %789  ;;  %811 = vrcp.f32 %v195_v36  ;;  %v440_v51 = vadd.f32 %v436_v5, %v368_v59  ;;  %v689_v23 = vmul.f32 -1.442695, %v439_v19  ;;  %v525_v9 = vmul.f32 %v1304_v14, %v524_v12 }
  0x74   :  { %813 = vrcp.f32 %v196_v35  ;;  %vm1351_vm12 = vcmp.lt.f32.partialorder %v526_v22, 0.0004427343  ;;  %v534_v1 = vmul.f32 %v1309_v6, %v533_v11  ;;  %v542_v30 = vadd.f32 1.0, %v541_v53  ;;  %v497_v53 = vld [vmem:[#allocation5 + $0xe8] sm:$0xff] }
  0x75   :  { %v792_v33 = vpop.eup %791  ;;  %v441_v41 = vadd.f32 %v437_v45, %v369_v31  ;;  %vm1356_vm13 = vcmp.lt.f32.partialorder %v535_v29, 0.0004427343  ;;  %v544_v28 = vand.u32 2147483647, %v1317_v18  ;;  %815 = vpow2.f32 %v688_v21 }
  0x76   :  { %v794_v13 = vpop.eup %793  ;;  %v522_v49 = vmul.f32 0.6931472, %v792_v33  ;;  %v503_v14 = vmax.f32 %v1231_v47, 0.0  ;;  %v551_v25 = vadd.f32 1.0, %v550_v24  ;;  %817 = vpow2.f32 %v689_v23 }
  0x77   :  { %v796_v10 = vpop.eup %795  ;;  %v531_v60 = vmul.f32 0.6931472, %v794_v13  ;;  %v690_v6 = vmul.f32 -1.442695, %v440_v51  ;;  %v553_v2 = vand.u32 2147483647, %v1327_v27  ;;  %v543_v32 = vmul.f32 %v1317_v18, %v542_v30 }
  0x78   :  { %v1362_v57 = vpop.eup %797  ;;  %v528_v63 = vsel %vm1351_vm12, %v525_v9, %v522_v49  ;;  %v596_v47 = vsub.f32 %v1029_v46, %v1043_v56  ;;  %v691_v34 = vmul.f32 -1.442695, %v441_v41  ;;  %vm1374_vm14 = vcmp.lt.f32.partialorder %v544_v28, 0.0004427343  ;;  %v496_v46 = vld [vmem:[#allocation5 + $0xe0] sm:$0xff]  ;;  %v498_v9 = vld [vmem:[#allocation5 + $0xf0] sm:$0xff] }
  0x79   :  { %v1367_v42 = vpop.eup %799  ;;  %v537_v50 = vsel %vm1356_vm13, %v534_v1, %v531_v60  ;;  %v556_v26 = vadd.f32 %v528_v63, %v500_v20  ;;  %v597_v5 = vsub.f32 %v1036_v52, %v1053_v62  ;;  %v324_v12 = vadd.f32 1.0, %v790_v61 }
  0x7a   :  { %v802_v43 = vpop.eup %801  ;;  %v557_v36 = vadd.f32 %v537_v50, %v501_v48  ;;  %v552_v18 = vmul.f32 %v1327_v27, %v551_v25  ;;  %819 = vpow2.f32 %v690_v6  ;;  %vm1383_vm15 = vcmp.lt.f32.partialorder %v553_v2, 0.0004427343  ;;  %v1503_v50 = vld [vmem:[#allocation13_spill] sm:$0xff] }
  0x7b   :  { %v1380_v19 = vpop.eup %803  ;;  %v540_v35 = vmul.f32 0.6931472, %v802_v43  ;;  %v560_v20 = vadd.f32 1e-06, %v556_v26  ;;  %v598_v11 = vsub.f32 %v1038_v54, %v1058_v3  ;;  %v600_v27 = vmul.f32 1.442695, %v596_v47 }
  0x7c   :  { %v806_v59 = vpop.eup %805  ;;  %v561_v22 = vadd.f32 1e-06, %v557_v36  ;;  %821 = vpow2.f32 %v691_v34  ;;  %v602_v61 = vmul.f32 1.442695, %v597_v5  ;;  %v599_v21 = vsub.f32 %v1040_v55, %v1061_v4  ;;  %v499_v55 = vld [vmem:[#allocation5 + $0xf8] sm:$0xff]  ;;  %v1505_v47 = vld [vmem:[#allocation14_spill] sm:$0xff] }
  0x7d   :  { %v546_v52 = vsel %vm1374_vm14, %v543_v32, %v540_v35  ;;  %v549_v62 = vmul.f32 0.6931472, %v806_v59  ;;  %v564_v45 = vmul.f32 %v560_v20, %v1184_v39  ;;  %823 = vpow2.f32 %v1335_v0 }
  0x7e   :  { %v558_v48 = vadd.f32 %v546_v52, %v502_v37  ;;  %v565_v29 = vmul.f32 %v561_v22, %v1200_v7  ;;  %v1393_v31 = vpop.eup %807  ;;  %825 = vrcp.f32 %v324_v12  ;;  %v325_v7 = vadd.f32 1.0, %v796_v10  ;;  %v1507_v12 = vld [vmem:[#allocation15_spill] sm:$0xff]  ;;  %v1509_v22 = vld [vmem:[#allocation16_spill] sm:$0xff] }
  0x7f   :  { %v555_v54 = vsel %vm1383_vm15, %v552_v18, %v549_v62  ;;  %v568_v3 = vadd.f32 %v564_v45, %v496_v46  ;;  %v1400_v24 = vpop.eup %809  ;;  %827 = vpow2.f32 %v600_v27  ;;  %v604_v0 = vmul.f32 1.442695, %v598_v11 }
  0x80   :  { %v559_v39 = vadd.f32 %v555_v54, %v503_v14  ;;  %v562_v51 = vadd.f32 1e-06, %v558_v48  ;;  %v569_v37 = vadd.f32 %v565_v29, %v497_v53  ;;  %v1402_v23 = vpop.eup %811  ;;  %829 = vpow2.f32 %v602_v61 }
  0x81   :  { %v692_v33 = vmul.f32 -1.442695, %v568_v3  ;;  %v1404_v40 = vpop.eup %813  ;;  %v606_v4 = vmul.f32 1.442695, %v599_v21  ;;  %v326_v10 = vadd.f32 1.0, %v1362_v57  ;;  %v197_v2 = vadd.f32 1.0, %v1343_v58 }
  0x82   :  { %v563_v1 = vadd.f32 1e-06, %v559_v39  ;;  %v566_v30 = vmul.f32 %v562_v51, %v1202_v8  ;;  %v693_v13 = vmul.f32 -1.442695, %v569_v37  ;;  %v816_v41 = vpop.eup %815  ;;  %v327_v26 = vadd.f32 1.0, %v1367_v42  ;;  %v1506_v57 = vld [vmem:[#allocation18_spill] sm:$0xff] }
  0x83   :  { %831 = vpow2.f32 %v692_v33  ;;  %v818_v28 = vpop.eup %817  ;;  %v454_v25 = vadd.f32 1.0, %v816_v41  ;;  %v349_v43 = vadd.f32 %v1506_v57, %v1505_v47  ;;  %v1508_v58 = vld [vmem:[#allocation19_spill] sm:$0xff]  ;;  %v351_v11 = vadd.f32 %v1333_v16, %v1509_v22 }
  0x84   :  { %v567_v49 = vmul.f32 %v563_v1, %v1240_v44  ;;  %v570_v38 = vadd.f32 %v566_v30, %v498_v9  ;;  %833 = vpow2.f32 %v693_v13  ;;  %v455_v8 = vadd.f32 1.0, %v818_v28  ;;  %v1504_v44 = vld [vmem:[#allocation17_spill] sm:$0xff] }
  0x85   :  { %835 = vpow2.f32 %v604_v0  ;;  %v348_v32 = vadd.f32 %v1504_v44, %v1503_v50  ;;  %v350_v35 = vadd.f32 %v1508_v58, %v1507_v12  ;;  %v479_v59 = vadd.f32 %v1380_v19, %v349_v43 }
  0x86   :  { %837 = vrcp.f32 %v325_v7  ;;  %v571_v14 = vadd.f32 %v567_v49, %v499_v55  ;;  %v694_v60 = vmul.f32 -1.442695, %v570_v38  ;;  %v222_v9 = vmul.f32 %v1393_v31, %v1503_v50 }
  0x87   :  { %839 = vpow2.f32 %v606_v4  ;;  %v820_v63 = vpop.eup %819  ;;  %v478_v18 = vadd.f32 %v1339_v17, %v348_v32  ;;  %v480_v52 = vadd.f32 %v1400_v24, %v350_v35  ;;  %v223_v33 = vmul.f32 %v1402_v23, %v1505_v47 }
  0x88   :  { %841 = vpow2.f32 %v694_v60  ;;  %v695_v6 = vmul.f32 -1.442695, %v571_v14  ;;  %v456_v36 = vadd.f32 1.0, %v820_v63  ;;  %v224_v38 = vmul.f32 %v1404_v40, %v1507_v12 }
  0x89   :  { %843 = vrcp.f32 %v326_v10  ;;  %v822_v34 = vpop.eup %821 }
  0x8a   :  { %845 = vpow2.f32 %v695_v6  ;;  %v1415_v15 = vpop.eup %823  ;;  %v457_v42 = vadd.f32 1.0, %v822_v34 }
  0x8b   :  { %847 = vrcp.f32 %v454_v25  ;;  %v826_v5 = vpop.eup %825  ;;  %v481_v3 = vadd.f32 %v1415_v15, %v351_v11 }
  0x8c   :  { %849 = vrcp.f32 %v455_v8  ;;  %v828_v20 = vpop.eup %827  ;;  %v352_v0 = vmul.f32 %v826_v5, %v1504_v44 }
  0x8d   :  { %851 = vrcp.f32 %v197_v2  ;;  %v830_v46 = vpop.eup %829  ;;  %v608_v45 = vadd.f32 %v828_v20, %v478_v18 }
  0x8e   :  { %853 = vrcp.f32 %v327_v26  ;;  %v609_v29 = vadd.f32 %v830_v46, %v479_v59  ;;  %v356_v31 = vadd.f32 %v352_v0, %v222_v9 }
  0x8f   :  { %855 = vrcp.f32 %v456_v36 }
  0x90   :  { %v832_v56 = vpop.eup %831  ;;  %857 = vrcp.f32 %v457_v42 }
  0x91   :  { %v834_v53 = vpop.eup %833  ;;  %v584_v62 = vadd.f32 1.0, %v832_v56 }
  0x92   :  { %v836_v27 = vpop.eup %835  ;;  %v585_v48 = vadd.f32 1.0, %v834_v53 }
  0x93   :  { %v838_v61 = vpop.eup %837  ;;  %859 = vrcp.f32 %v584_v62  ;;  %v610_v39 = vadd.f32 %v836_v27, %v480_v52 }
  0x94   :  { %v840_v54 = vpop.eup %839  ;;  %861 = vrcp.f32 %v585_v48  ;;  %v353_v30 = vmul.f32 %v838_v61, %v1506_v57 }
  0x95   :  { %v842_v21 = vpop.eup %841  ;;  %863 = vrcp.f32 %v608_v45  ;;  %v611_v55 = vadd.f32 %v840_v54, %v481_v3 }
  0x96   :  { %v844_v51 = vpop.eup %843  ;;  %v586_v37 = vadd.f32 1.0, %v842_v21  ;;  %865 = vrcp.f32 %v609_v29  ;;  %v357_v10 = vadd.f32 %v353_v30, %v223_v33 }
  0x97   :  { %v846_v7 = vpop.eup %845  ;;  %v354_v23 = vmul.f32 %v844_v51, %v1508_v58 }
  0x98   :  { %v848_v1 = vpop.eup %847  ;;  %v587_v13 = vadd.f32 1.0, %v846_v7  ;;  %867 = vrcp.f32 %v586_v37 }
  0x99   :  { %v850_v4 = vpop.eup %849  ;;  %869 = vrcp.f32 %v610_v39  ;;  %v482_v28 = vmul.f32 %v848_v1, %v1339_v17  ;;  %v358_v50 = vadd.f32 %v354_v23, %v224_v38 }
  0x9a   :  { %v852_v41 = vpop.eup %851  ;;  %871 = vrcp.f32 %v587_v13  ;;  %v483_v14 = vmul.f32 %v850_v4, %v1380_v19 }
  0x9b   :  { %v854_v49 = vpop.eup %853  ;;  %873 = vrcp.f32 %v611_v55  ;;  %v225_v25 = vmul.f32 %v852_v41, %v1509_v22  ;;  %v486_v63 = vadd.f32 %v482_v28, %v356_v31 }
  0x9c   :  { %v856_v60 = vpop.eup %855  ;;  %v355_v8 = vmul.f32 %v854_v49, %v1333_v16  ;;  %v487_v44 = vadd.f32 %v483_v14, %v357_v10 }
  0x9d   :  { %v858_v6 = vpop.eup %857  ;;  %v484_v40 = vmul.f32 %v856_v60, %v1400_v24 }
  0x9e   :  { %v359_v47 = vadd.f32 %v355_v8, %v225_v25  ;;  %v485_v57 = vmul.f32 %v858_v6, %v1415_v15 }
  0x9f   :  { %v488_v36 = vadd.f32 %v484_v40, %v358_v50 }
  0xa0   :  { %v860_v2 = vpop.eup %859  ;;  %v489_v35 = vadd.f32 %v485_v57, %v359_v47 }
  0xa1   :  { %v862_v32 = vpop.eup %861  ;;  %v612_v17 = vmul.f32 %v860_v2, %v828_v20 }
  0xa2   :  { %v864_v26 = vpop.eup %863  ;;  %v613_v19 = vmul.f32 %v862_v32, %v830_v46 }
  0xa3   :  { %v866_v43 = vpop.eup %865  ;;  %v616_v34 = vadd.f32 %v612_v17, %v486_v63 }
  0xa4   :  { %v617_v5 = vadd.f32 %v613_v19, %v487_v44 }
  0xa5   :  { %v868_v12 = vpop.eup %867  ;;  %v621_v16 = vmul.f32 %v864_v26, %v616_v34 }
  0xa6   :  { %v870_v58 = vpop.eup %869  ;;  %v614_v18 = vmul.f32 %v868_v12, %v836_v27  ;;  %v623_v42 = vmul.f32 %v866_v43, %v617_v5 }
  0xa7   :  { %v872_v59 = vpop.eup %871  ;;  %v628_v24 = vmul.f32 0.999999, %v621_v16 }
  0xa8   :  { %v615_v56 = vmul.f32 %v872_v59, %v840_v54  ;;  %v618_v22 = vadd.f32 %v614_v18, %v488_v36  ;;  %v629_v20 = vmul.f32 0.999999, %v623_v42  ;;  %v874_v11 = vpop.eup %873 }
  0xa9   :  { %v632_v53 = vadd.f32 5e-07, %v628_v24 }
  0xaa   :  { %v619_v52 = vadd.f32 %v615_v56, %v489_v35  ;;  %v625_v15 = vmul.f32 %v870_v58, %v618_v22  ;;  %v633_v46 = vadd.f32 5e-07, %v629_v20 }
  0xab   :  { %v636_v62 = vsub.f32 1.0, %v632_v53 }
  0xac   :  { %v627_v45 = vmul.f32 %v874_v11, %v619_v52  ;;  %v630_v48 = vmul.f32 0.999999, %v625_v15  ;;  %v637_v29 = vsub.f32 1.0, %v633_v46 }
  0xad   :  { %875 = vrcp.f32 %v636_v62 }
  0xae   :  { %v631_v61 = vmul.f32 0.999999, %v627_v45  ;;  %v634_v3 = vadd.f32 5e-07, %v630_v48  ;;  %877 = vrcp.f32 %v637_v29 }
  0xb0   :  { %v635_v27 = vadd.f32 5e-07, %v631_v61  ;;  %v638_v21 = vsub.f32 1.0, %v634_v3 }
  0xb2   :  { %v639_v39 = vsub.f32 1.0, %v635_v27  ;;  %879 = vrcp.f32 %v638_v21 }
  0xb4   :  { %881 = vrcp.f32 %v639_v39 }
  0xba   :  { %v876_v54 = vpop.eup %875 }
  0xbb   :  { %v878_v51 = vpop.eup %877  ;;  %v641_v37 = vmul.f32 %v876_v54, %v632_v53 }
  0xbc   :  { %v643_v7 = vmul.f32 %v878_v51, %v633_v46 }
  0xbd   :  { %883 = vlog2.f32 %v641_v37 }
  0xbe   :  { %885 = vlog2.f32 %v643_v7 }
  0xbf   :  { %v880_v9 = vpop.eup %879 }
  0xc0   :  { %v645_v33 = vmul.f32 %v880_v9, %v634_v3 }
  0xc1   :  { %v882_v0 = vpop.eup %881 }
  0xc2   :  { %v647_v1 = vmul.f32 %v882_v0, %v635_v27  ;;  %887 = vlog2.f32 %v645_v33 }
  0xc4   :  { %889 = vlog2.f32 %v647_v1 }
  0xca   :  { %v884_v30 = vpop.eup %883 }
  0xcb   :  { %v886_v13 = vpop.eup %885  ;;  %v649_v55 = vmul.f32 0.6931472, %v884_v30 }
  0xcc   :  { %v651_v4 = vmul.f32 0.6931472, %v886_v13 }
  0xcd   :  { %656 = vst [vmem:[#allocation7] sm:$0xff] %v649_v55 }
  0xce   :  { %657 = vst [vmem:[#allocation7 + $0x8] sm:$0xff] %v651_v4 }
  0xcf   :  { %v888_v41 = vpop.eup %887 }
  0xd0   :  { %v653_v49 = vmul.f32 0.6931472, %v888_v41 }
  0xd1   :  { %v890_v38 = vpop.eup %889 }
  0xd2   :  { %v655_v31 = vmul.f32 0.6931472, %v890_v38  ;;  %658 = vst [vmem:[#allocation7 + $0x10] sm:$0xff] %v653_v49 }
  0xd4   :  { %659 = vst [vmem:[#allocation7 + $0x18] sm:$0xff] %v655_v31 }
  0xd5   :  { %664 = vsyncadd [#allocation4], 384  ;;  %s947_s1 = smov [#allocation7]  }
  0xd6   :  { %s665_s29 = sshll.u32 %s947_s1, 4  ;;  %s666_s29 = int_to_ptr.vmem [resolvable:$true] %s665_s29 }
  0xd7   :  { %s911_s30 = scalar_lea.vmem %s666_s29, 128  ;;  %s915_s3 = scalar_lea.vmem %s666_s29, 512 }
  0xd8   :  { %p912_p5 = scmp.ne.s32.totalorder %s666_s29, %s911_s30  ;;  %p916_p6 = scmp.lt.s32.totalorder %s666_s29, %s666_s29 }
  0xd9   :  { %p917_p7 = scmp.lt.s32.totalorder %s915_s3, %s911_s30 }
  0xdb   :  { %p918_p8 = por %p917_p7, %p916_p6 }
  0xdd   :  { %p919_p9 = pnand %p918_p8, %p912_p5 }
  0xdf   :  { %922 = shalt.err (!%p919_p9)
}
  0xe0   :  { %671 = dma.vmem_to_hbm [thread:$0]  %s666_s29, 128, %s1448_s2, [#allocation4], %s938_s13, %s938_s13, %s939_s14  }
  0xe1   :  { %935 = dma.done.wait [#allocation4], 512  }
  0xe2   :  { %936 = vsyncadd [#allocation4], 4294966784 }
  0xe3   :  { %675 = vsyncpa [#allocation3], 1 }
  0xe4   :  { %676 = vsyncpa [#allocation6], 1 }
  0xe5   :  { %677 = vsyncpa [#allocation4], 1 }

</bundles_post_ra>
